<compile_context>
chip_gen: v7x
topology: tpu7x:2x2x1
jax: 0.10.0
libtpu: 0.0.40
codegen_flags: <defaults>
</compile_context>

<pallas_src>
import jax
import jax.numpy as jnp
from jax import lax
from jax.experimental import pallas as pl
from jax.experimental.pallas import tpu as pltpu


def _round_up(n, m):
    return ((n + m - 1) // m) * m


def _mlp_kernel(x_ref, wf_ref, bf_ref, wb_ref, bb_ref, wh_ref, bh_ref, out_ref):
    # x_ref: (TB, 10) batch tile.  Weights/biases are whole small arrays.
    x = x_ref[...]
    h = jnp.maximum(
        jnp.dot(x, wf_ref[...], preferred_element_type=jnp.float32) + bf_ref[...],
        0.0,
    )
    h = jnp.maximum(
        jnp.dot(h, wb_ref[...], preferred_element_type=jnp.float32) + bb_ref[...],
        0.0,
    )
    # Fused task heads, emitted feature-major (lane-dense):
    #   outT[f, b] = sum_k wh[k, f] * h[b, k]   -> shape (4, TB)
    out_t = lax.dot_general(
        wh_ref[...], h,
        dimension_numbers=(((0,), (1,)), ((), ())),
        preferred_element_type=jnp.float32,
    )
    out_ref[...] = (out_t + bh_ref[...]).astype(out_ref.dtype)


def _pack_params(params):
    """Transpose weights to (in, out) layout and fuse the two heads."""
    f32 = jnp.float32
    wf = params["freeze_w"].T.astype(f32)                    # (10, 10)
    bf = params["freeze_b"].astype(f32).reshape(1, 10)        # (1, 10)
    wb = params["base1_w"].T.astype(f32)                      # (10, 10)
    bb = params["base1_b"].astype(f32).reshape(1, 10)         # (1, 10)
    wh = jnp.concatenate(
        [params["task1_w"].T.astype(f32), params["task2_w"].T.astype(f32)], axis=1
    )                                                          # (10, 4)
    bh = jnp.concatenate(
        [params["task1_b"].astype(f32), params["task2_b"].astype(f32)]
    ).reshape(4, 1)                                            # (4, 1)
    return wf, bf, wb, bb, wh, bh


def _choose_tile(B, tile_b):
    """Pick (TB, n_tiles, B_pad).  Single full-batch tile whenever it fits."""
    if B <= tile_b:
        return B, 1, B  # block == full array dims -> no (8,128) constraint, no pad
    n = pl.cdiv(B, tile_b)
    TB = _round_up(pl.cdiv(B, n), 128)  # lane-dense out tile => multiple of 128
    n = pl.cdiv(B, TB)
    return TB, n, n * TB


def net_forward(x, params, *, tile_b=8192):
    """Pallas forward for `Net`. Returns (t1, t2), each shaped (B, 2)."""
    B, F = x.shape
    assert F == 10
    x = x.astype(jnp.float32)

    wf, bf, wb, bb, wh, bh = _pack_params(params)

    TB, n_tiles, B_pad = _choose_tile(B, tile_b)
    if B_pad != B:  # only on the multi-tile path
        x = jnp.pad(x, ((0, B_pad - B), (0, 0)))

    flops = 2 * B_pad * (10 * 10 + 10 * 10 + 10 * 4)
    bytes_accessed = B_pad * 10 * 4 + B_pad * 4 * 4 + (100 + 100 + 40 + 10 + 10 + 4) * 4

    resident = lambda i: (0, 0)  # weights/biases stay in VMEM across the grid
    out = pl.pallas_call(
        _mlp_kernel,
        out_shape=jax.ShapeDtypeStruct((4, B_pad), jnp.float32),
        grid=(n_tiles,),
        in_specs=[
            pl.BlockSpec((TB, 10), lambda i: (i, 0)),  # x tile, pipelined over batch
            pl.BlockSpec((10, 10), resident),          # freeze W
            pl.BlockSpec((1, 10), resident),           # freeze b
            pl.BlockSpec((10, 10), resident),          # base1 W
            pl.BlockSpec((1, 10), resident),           # base1 b
            pl.BlockSpec((10, 4), resident),           # fused heads W
            pl.BlockSpec((4, 1), resident),            # fused heads b
        ],
        out_specs=pl.BlockSpec((4, TB), lambda i: (0, i)),  # lane-dense, feature-major
        compiler_params=pltpu.CompilerParams(
            dimension_semantics=("parallel",),
            vmem_limit_bytes=48 * 1024 * 1024,
        ),
        cost_estimate=pl.CostEstimate(
            flops=flops, transcendentals=0, bytes_accessed=bytes_accessed
        ),
    )(x, wf, bf, wb, bb, wh, bh)

    out = out[:, :B]
    return out[:2, :].T, out[2:, :].T


def init_params(key):
    """Deterministic init mimicking nn.Linear default (uniform +-1/sqrt(fan_in))."""
    def linear(key, out_f, in_f):
        kw, kb = jax.random.split(key)
        bound = 1.0 / jnp.sqrt(jnp.float32(in_f))
        w = jax.random.uniform(kw, (out_f, in_f), jnp.float32, -bound, bound)
        b = jax.random.uniform(kb, (out_f,), jnp.float32, -bound, bound)
        return w, b

    k1, k2, k3, k4 = jax.random.split(key, 4)
    fw, fb = linear(k1, 10, 10)
    bw, bb = linear(k2, 10, 10)
    t1w, t1b = linear(k3, 2, 10)
    t2w, t2b = linear(k4, 2, 10)
    return {
        "freeze_w": fw, "freeze_b": fb,
        "base1_w": bw, "base1_b": bb,
        "task1_w": t1w, "task1_b": t1b,
        "task2_w": t2w, "task2_b": t2b,
    }


def net_forward_ref(x, p):
    h = jnp.maximum(x @ p["freeze_w"].T + p["freeze_b"], 0.0)
    h = jnp.maximum(h @ p["base1_w"].T + p["base1_b"], 0.0)
    return h @ p["task1_w"].T + p["task1_b"], h @ p["task2_w"].T + p["task2_b"]


if __name__ == "__main__":
    key = jax.random.PRNGKey(0)
    kx, kx2, kp = jax.random.split(key, 3)
    params = init_params(kp)

    # Small batch: single grid step, no padding, no concat.
    B = 8
    x = jax.random.normal(kx, (B, 10), jnp.float32)
    t1, t2 = net_forward(x, params)
    jax.block_until_ready((t1, t2))
    r1, r2 = net_forward_ref(x, params)
    assert t1.shape == (B, 2) and t2.shape == (B, 2)
    assert jnp.allclose(t1, r1, atol=1e-5) and jnp.allclose(t2, r2, atol=1e-5)

    # Ragged batch with forced small tile: exercises multi-tile + padding +
    # megacore-parallel grid path.
    B2 = 300
    x2 = jax.random.normal(kx2, (B2, 10), jnp.float32)
    u1, u2 = net_forward(x2, params, tile_b=128)
    jax.block_until_ready((u1, u2))
    s1, s2 = net_forward_ref(x2, params)
    assert u1.shape == (B2, 2) and u2.shape == (B2, 2)
    assert jnp.allclose(u1, s1, atol=1e-5) and jnp.allclose(u2, s2, atol=1e-5)

    print("KERNEL_OK")
</pallas_src>

<mosaic_0001>
module attributes {stable_mosaic.version = 11 : i64} {
  func.func @_mlp_kernel(%arg0: i32, %arg1: memref<8x10xf32, #tpu.memory_space<vmem>>, %arg2: memref<10x10xf32, #tpu.memory_space<vmem>>, %arg3: memref<1x10xf32, #tpu.memory_space<vmem>>, %arg4: memref<10x10xf32, #tpu.memory_space<vmem>>, %arg5: memref<1x10xf32, #tpu.memory_space<vmem>>, %arg6: memref<10x4xf32, #tpu.memory_space<vmem>>, %arg7: memref<4x1xf32, #tpu.memory_space<vmem>>, %arg8: memref<4x8xf32, #tpu.memory_space<vmem>>) attributes {dimension_semantics = [#tpu.dimension_semantics<parallel>], iteration_bounds = array<i64: 1>, scalar_prefetch = 0 : i64, scratch_operands = 0 : i64, tpu.core_type = #tpu.core_type<tc>, window_params = [{transform_indices = @transform_0, window_bounds = array<i64: 8, 10>}, {pipeline_mode = #tpu.pipeline_mode<synchronous>, transform_indices = @transform_1, window_bounds = array<i64: 10, 10>}, {pipeline_mode = #tpu.pipeline_mode<synchronous>, transform_indices = @transform_2, window_bounds = array<i64: 1, 10>}, {pipeline_mode = #tpu.pipeline_mode<synchronous>, transform_indices = @transform_3, window_bounds = array<i64: 10, 10>}, {pipeline_mode = #tpu.pipeline_mode<synchronous>, transform_indices = @transform_4, window_bounds = array<i64: 1, 10>}, {pipeline_mode = #tpu.pipeline_mode<synchronous>, transform_indices = @transform_5, window_bounds = array<i64: 10, 4>}, {pipeline_mode = #tpu.pipeline_mode<synchronous>, transform_indices = @transform_6, window_bounds = array<i64: 4, 1>}, {transform_indices = @transform_7, window_bounds = array<i64: 4, 8>}]} {
    %c0 = arith.constant 0 : index
    %c0_0 = arith.constant 0 : index
    %0 = vector.load %arg1[%c0, %c0_0] : memref<8x10xf32, #tpu.memory_space<vmem>>, vector<8x10xf32>
    %c0_1 = arith.constant 0 : index
    %c0_2 = arith.constant 0 : index
    %1 = vector.load %arg2[%c0_1, %c0_2] : memref<10x10xf32, #tpu.memory_space<vmem>>, vector<10x10xf32>
    %cst = arith.constant dense<0.000000e+00> : vector<8x10xf32>
    %2 = tpu.matmul %0, %1, %cst {dimension_numbers = #tpu.dot_dimension_numbers<[1], [0], [0], [1], [0, 0, 1, 1], [], []>} : vector<8x10xf32>, vector<10x10xf32>, vector<8x10xf32> -> vector<8x10xf32>
    %c0_3 = arith.constant 0 : index
    %c0_4 = arith.constant 0 : index
    %3 = vector.load %arg3[%c0_3, %c0_4] : memref<1x10xf32, #tpu.memory_space<vmem>>, vector<1x10xf32>
    %4 = vector.broadcast %3 : vector<1x10xf32> to vector<8x10xf32>
    %5 = arith.addf %2, %4 : vector<8x10xf32>
    %cst_5 = arith.constant 0.000000e+00 : f32
    %6 = vector.broadcast %cst_5 : f32 to vector<8x10xf32>
    %7 = arith.maximumf %5, %6 : vector<8x10xf32>
    %c0_6 = arith.constant 0 : index
    %c0_7 = arith.constant 0 : index
    %8 = vector.load %arg4[%c0_6, %c0_7] : memref<10x10xf32, #tpu.memory_space<vmem>>, vector<10x10xf32>
    %cst_8 = arith.constant dense<0.000000e+00> : vector<8x10xf32>
    %9 = tpu.matmul %7, %8, %cst_8 {dimension_numbers = #tpu.dot_dimension_numbers<[1], [0], [0], [1], [0, 0, 1, 1], [], []>} : vector<8x10xf32>, vector<10x10xf32>, vector<8x10xf32> -> vector<8x10xf32>
    %c0_9 = arith.constant 0 : index
    %c0_10 = arith.constant 0 : index
    %10 = vector.load %arg5[%c0_9, %c0_10] : memref<1x10xf32, #tpu.memory_space<vmem>>, vector<1x10xf32>
    %11 = vector.broadcast %10 : vector<1x10xf32> to vector<8x10xf32>
    %12 = arith.addf %9, %11 : vector<8x10xf32>
    %cst_11 = arith.constant 0.000000e+00 : f32
    %13 = vector.broadcast %cst_11 : f32 to vector<8x10xf32>
    %14 = arith.maximumf %12, %13 : vector<8x10xf32>
    %c0_12 = arith.constant 0 : index
    %c0_13 = arith.constant 0 : index
    %15 = vector.load %arg6[%c0_12, %c0_13] : memref<10x4xf32, #tpu.memory_space<vmem>>, vector<10x4xf32>
    %cst_14 = arith.constant dense<0.000000e+00> : vector<4x8xf32>
    %16 = tpu.matmul %15, %14, %cst_14 {dimension_numbers = #tpu.dot_dimension_numbers<[0], [1], [1], [0], [0, 1, 1, 0], [], []>} : vector<10x4xf32>, vector<8x10xf32>, vector<4x8xf32> -> vector<4x8xf32>
    %c0_15 = arith.constant 0 : index
    %c0_16 = arith.constant 0 : index
    %17 = vector.load %arg7[%c0_15, %c0_16] : memref<4x1xf32, #tpu.memory_space<vmem>>, vector<4x1xf32>
    %18 = vector.broadcast %17 : vector<4x1xf32> to vector<4x8xf32>
    %19 = arith.addf %16, %18 : vector<4x8xf32>
    %c0_17 = arith.constant 0 : index
    %c0_18 = arith.constant 0 : index
    %20 = vector.load %arg8[%c0_17, %c0_18] : memref<4x8xf32, #tpu.memory_space<vmem>>, vector<4x8xf32>
    tpu.vector_store %arg8[%c0_17, %c0_18], %19 {strides = array<i32>} : memref<4x8xf32, #tpu.memory_space<vmem>>, vector<4x8xf32>,
    return
  }
  func.func @transform_0(%arg0: i32) -> (i32, i32) {
    %c0_i32 = arith.constant 0 : i32
    %c0_i32_0 = arith.constant 0 : i32
    return %arg0, %c0_i32 : i32, i32
  }
  func.func @transform_1(%arg0: i32) -> (i32, i32) {
    %c0_i32 = arith.constant 0 : i32
    %c0_i32_0 = arith.constant 0 : i32
    %c0_i32_1 = arith.constant 0 : i32
    return %c0_i32, %c0_i32_0 : i32, i32
  }
  func.func @transform_2(%arg0: i32) -> (i32, i32) {
    %c0_i32 = arith.constant 0 : i32
    %c0_i32_0 = arith.constant 0 : i32
    %c0_i32_1 = arith.constant 0 : i32
    return %c0_i32, %c0_i32_0 : i32, i32
  }
  func.func @transform_3(%arg0: i32) -> (i32, i32) {
    %c0_i32 = arith.constant 0 : i32
    %c0_i32_0 = arith.constant 0 : i32
    %c0_i32_1 = arith.constant 0 : i32
    return %c0_i32, %c0_i32_0 : i32, i32
  }
  func.func @transform_4(%arg0: i32) -> (i32, i32) {
    %c0_i32 = arith.constant 0 : i32
    %c0_i32_0 = arith.constant 0 : i32
    %c0_i32_1 = arith.constant 0 : i32
    return %c0_i32, %c0_i32_0 : i32, i32
  }
  func.func @transform_5(%arg0: i32) -> (i32, i32) {
    %c0_i32 = arith.constant 0 : i32
    %c0_i32_0 = arith.constant 0 : i32
    %c0_i32_1 = arith.constant 0 : i32
    return %c0_i32, %c0_i32_0 : i32, i32
  }
  func.func @transform_6(%arg0: i32) -> (i32, i32) {
    %c0_i32 = arith.constant 0 : i32
    %c0_i32_0 = arith.constant 0 : i32
    %c0_i32_1 = arith.constant 0 : i32
    return %c0_i32, %c0_i32_0 : i32, i32
  }
  func.func @transform_7(%arg0: i32) -> (i32, i32) {
    %c0_i32 = arith.constant 0 : i32
    %c0_i32_0 = arith.constant 0 : i32
    return %c0_i32, %arg0 : i32, i32
  }
}

</mosaic_0001>

<bundles_post_ra>
// kernel: tpu_custom_call.1
= control target key start
LH: loop header
LB: loop body
LE: loop exit
PB: predicated region body
PF: predicated region fallthrough
CT: control target
= control target key end

     0   :  { %12 = vsyncpa [#allocation3], 0  ;;  %s597_s0 = inlined_call_operand.hbm [shape: f32[8,10], index: 0, kind: input, shape index: {}]   ;;  %s598_s1 = inlined_call_operand.vmem [shape: f32[10,10], index: 1, kind: input, shape index: {}]   ;;  %s599_s2 = inlined_call_operand.hbm [shape: f32[1,10], index: 2, kind: input, shape index: {}]   ;;  %s600_s3 = inlined_call_operand.vmem [shape: f32[10,10], index: 3, kind: input, shape index: {}]   ;;  %s601_s4 = inlined_call_operand.vmem [shape: f32[1,10], index: 4, kind: input, shape index: {}]   ;;  %s602_s5 = inlined_call_operand.vmem [shape: f32[10,4], index: 5, kind: input, shape index: {}]   ;;  %s603_s6 = inlined_call_operand.vmem [shape: f32[4,1], index: 6, kind: input, shape index: {}]   ;;  %s604_s7 = inlined_call_operand.hbm [shape: f32[4,8], index: 7, kind: output, shape index: {}]  }
   0x1   :  { %13 = vsyncpa [#allocation6], 0 }
   0x2   :  { %14 = vsyncpa [#allocation4], 0  ;;  %s485_s24 = smov [#allocation2]   ;;  %s486_s26 = smov [#allocation5]  }
   0x3   :  { %s21_s25 = sshll.u32 %s485_s24, 4  ;;  %s33_s27 = sshll.u32 %s486_s26, 4  ;;  %s22_s25 = int_to_ptr.vmem [resolvable:$true] %s21_s25  ;;  %s34_s27 = int_to_ptr.vmem [resolvable:$true] %s33_s27 }
   0x4   :  { %s413_s30 = scalar_lea.hbm %s597_s0, 128 }
   0x5   :  { %p414_p0 = scmp.ne.s32.totalorder %s597_s0, %s413_s30  ;;  %p417_p1 = scmp.lt.u32.totalorder %s413_s30, %s597_s0 }
   0x7   :  { %p419_p2 = pnand %p417_p1, %p414_p0 }
   0x9   :  { %422 = shalt.err (!%p419_p2)
}
   0xa   :  { %s423_s12 = scalar_lea.vmem %s22_s25, 128  ;;  %p428_p4 = scmp.lt.s32.totalorder %s22_s25, %s22_s25 }
   0xb   :  { %p424_p3 = scmp.ne.s32.totalorder %s22_s25, %s423_s12  ;;  %p429_p5 = scmp.lt.s32.totalorder %s423_s12, %s423_s12 }
   0xd   :  { %p430_p6 = por %p429_p5, %p428_p4 }
   0xf   :  { %p431_p7 = pnand %p430_p6, %p424_p3 }
  0x11   :  { %434 = shalt.err (!%p431_p7)
}
  0x12   :  { %24 = dma.hbm_to_vmem [thread:$0]  %s597_s0, 128, %s22_s25, [#allocation3]  }
  0x13   :  { %s435_s17 = scalar_lea.hbm %s599_s2, 16 }
  0x14   :  { %p436_p8 = scmp.ne.s32.totalorder %s599_s2, %s435_s17  ;;  %p439_p9 = scmp.lt.u32.totalorder %s435_s17, %s599_s2 }
  0x16   :  { %p441_p10 = pnand %p439_p9, %p436_p8 }
  0x18   :  { %444 = shalt.err (!%p441_p10)
}
  0x19   :  { %s445_s22 = scalar_lea.vmem %s34_s27, 16  ;;  %s449_s23 = scalar_lea.vmem %s34_s27, 32 }
  0x1a   :  { %p446_p11 = scmp.ne.s32.totalorder %s34_s27, %s445_s22  ;;  %p450_p12 = scmp.lt.s32.totalorder %s34_s27, %s34_s27 }
  0x1b   :  { %p451_p13 = scmp.lt.s32.totalorder %s449_s23, %s445_s22 }
  0x1d   :  { %p452_p0 = por %p451_p13, %p450_p12 }
  0x1f   :  { %p453_p1 = pnand %p452_p0, %p446_p11 }
  0x21   :  { %456 = shalt.err (!%p453_p1)
}
  0x22   :  { %36 = dma.hbm_to_vmem [thread:$0]  %s599_s2, 16, %s34_s27, [#allocation6]  }
  0x23   :  { %479 = dma.done.wait [#allocation3], 128  }
  0x24   :  { %480 = vsyncadd [#allocation3], 4294967168 }
  0x25   :  { %481 = dma.done.wait [#allocation6], 16  }
  0x26   :  { %482 = vsyncadd [#allocation6], 4294967280  ;;  %v487_v0 = vmov 0.0|0.0   ;;  %vm488_vm0 = vmmov 0   ;;  %v489_v1 = vmov 0.0   ;;  %vm65_vm1 = vcmask 1041408  }
  0x27   :  { %395 = vmatprep.subr.bf16.mxu0 %v487_v0  ;;  %399 = vmatprep.subr.bf16.mxu1 %v487_v0  ;;  %v52_v2 = vld [vmem:[%s598_s1] sm:$0xff]  ;;  %v53_v3 = vld [vmem:[%s598_s1 + $0x8] sm:$0x3]  ;;  %vm490_vm2 = vmmov 1   ;;  %vm61_vm4 = vcmask 80896   ;;  %v491_v17 = vmov 0  }
  0x28   :  { %380 = vmatprep.mubr.msk.f32.mxu0 %vm488_vm0, %v489_v1  ;;  %387 = vmatprep.mubr.msk.f32.mxu1 %vm488_vm0, %v489_v1  ;;  %vm397_vm3 = vmpackc.low %vm65_vm1, %vm490_vm2  ;;  %v396_v4 = vpack.c.bf16 %v53_v3, %v52_v2  ;;  %v51_v5 = vld [vmem:[#allocation2] sm:$0xff]  ;;  %v141_v7 = vld [vmem:[%s600_s3 + $0x8] sm:$0x3]  ;;  %vm342_vm5 = vcmask 60416  }
  0x29   :  { %v140_v6 = vld [vmem:[%s600_s3] sm:$0xff]  ;;  %v227_v10 = vld [vmem:[%s602_s5 + $0x8] sm:$0x3]  ;;  %411 = vset.pattern.permute.xlu1 %v491_v17 }
  0x2a   :  { %398 = vmatpush3.bf16.msk.msra.mxu0 %vm397_vm3, %v396_v4  ;;  %v400_v8 = vpack.c.bf16 %v141_v7, %v140_v6  ;;  %v226_v9 = vld [vmem:[%s602_s5] sm:$0xff]  ;;  %v360_v11 = vld [vmem:[#allocation5] ss:$0 sm:$0xff]  ;;  %s492_s5 = smov [#allocation7]  }
  0x2b   :  { %390 = vmatprep.subr.mxu0 %v489_v1  ;;  %234 = vxpose.xlu0.b32.start [1/2] (short) (narrow) %v226_v9, 8  ;;  %v228_v16 = vld [vmem:[%s603_s6] sm:$0xf]  ;;  %s350_s6 = sshll.u32 %s492_s5, 4  ;;  %s351_s6 = int_to_ptr.vmem [resolvable:$true] %s350_s6 }
  0x2c   :  { %402 = vmatpush3.bf16.msk.msra.mxu1 %vm397_vm3, %v400_v8  ;;  %231 = vperm.xlu1 %411, %v228_v16   ;;  %v363_v18 = vld [vmem:[%s601_s4] ss:$0 sm:$0xff]  ;;  %s457_s15 = scalar_lea.vmem %s351_s6, 64  ;;  %p462_p3 = scmp.lt.s32.totalorder %s351_s6, %s351_s6 }
  0x2d   :  { %381 = vmatmul.mubr.msk.f32.vlgmr.msra.gmra.mrb[0].mxu0 %vm61_vm4, %v51_v5  ;;  %p458_p2 = scmp.ne.s32.totalorder %s351_s6, %s457_s15  ;;  %p463_p4 = scmp.lt.s32.totalorder %s457_s15, %s457_s15 }
  0x2e   :  { %392 = vmatprep.mubr.msk.f32.mxu0 %vm488_vm0, %v489_v1 }
  0x2f   :  { %235 = vxpose.xlu0.b32.end [2/2] (short) (narrow) %v227_v10, 8  ;;  %p464_p5 = por %p463_p4, %p462_p3 }
  0x31   :  { %p465_p6 = pnand %p464_p5, %p458_p2 }
  0x58   :  { %412 = vset.pattern.permute.xlu0 %v491_v17 }
  0xab   :  { %v250_v23 = vpop.trf.xlu0  ;;  %v232_v24 = vpop.permute.xlu1 %231 }
 0x100   :  { %v135_v12 = vpop.f32.mrb[0].mxu0 }
 0x101   :  { %v136_v13 = vadd.f32 %v360_v11, %v135_v12  ;;  %v382_v14 = vpop.f32.mrb[1].mxu0 }
 0x103   :  { %v139_v15 = vmax.f32 %v136_v13, 0.0 }
 0x105   :  { %388 = vmatmul.mubr.msk.f32.vlgmr.msra.gmra.mrb[0].mxu1 %vm61_vm4, %v139_v15 }
 0x1d8   :  { %v221_v19 = vpop.f32.mrb[0].mxu1 }
 0x1d9   :  { %v222_v20 = vadd.f32 %v363_v18, %v221_v19  ;;  %v389_v21 = vpop.f32.mrb[1].mxu1 }
 0x1db   :  { %v225_v22 = vmax.f32 %v222_v20, 0.0 }
 0x1dd   :  { %391 = vmatpush3.xpose.msk.msra.mxu0 %vm61_vm4, %v225_v22 }
 0x1e0   :  { %393 = vmatmul.mubr.msk.f32.vlgmr.msra.gmra.mrb[2].mxu0 %vm61_vm4, %v250_v23 }
 0x2b3   :  { %v338_v25 = vpop.f32.mrb[2].mxu0 }
 0x2b4   :  { %v339_v26 = vadd.f32 %v338_v25, %v232_v24  ;;  %v394_v27 = vpop.f32.mrb[3].mxu0 }
 0x2b6   :  { %343 = vst.msk [vmem:[#allocation7] sm:$0xf] %vm342_vm5, %v339_v26 }
 0x2b7   :  { %468 = shalt.err (!%p465_p6)
}
 0x2b8   :  { %s469_s17 = scalar_lea.hbm %s604_s7, 64 }
 0x2b9   :  { %p470_p7 = scmp.ne.s32.totalorder %s604_s7, %s469_s17  ;;  %p473_p8 = scmp.lt.u32.totalorder %s469_s17, %s604_s7 }
 0x2bb   :  { %p475_p9 = pnand %p473_p8, %p470_p7 }
 0x2bd   :  { %478 = shalt.err (!%p475_p9)
}
 0x2be   :  { %353 = dma.vmem_to_hbm [thread:$0]  %s351_s6, 64, %s604_s7, [#allocation4]  }
 0x2bf   :  { %483 = dma.done.wait [#allocation4], 64  }
 0x2c0   :  { %484 = vsyncadd [#allocation4], 4294967232 }
 0x2c1   :  { %357 = vsyncpa [#allocation3], 1 }
 0x2c2   :  { %358 = vsyncpa [#allocation6], 1 }
 0x2c3   :  { %359 = vsyncpa [#allocation4], 1 }

</bundles_post_ra>
